<compile_context>
chip_gen: v7x
topology: tpu7x:2x2x1
jax: 0.10.0
libtpu: 0.0.40
codegen_flags: <defaults>
</compile_context>

<pallas_src>
import functools

import jax
import jax.numpy as jnp
from jax.experimental import pallas as pl
from jax.experimental.pallas import tpu as pltpu


# ---------------------------------------------------------------------------
# Sizing helpers
# ---------------------------------------------------------------------------
def _round_up(n, m):
    return ((n + m - 1) // m) * m


def _vmem_capacity_bytes():
    """Per-generation VMEM capacity (v7x: 64 MiB, v5e/v6e: 128 MiB)."""
    try:
        return int(pltpu.get_tpu_info().vmem_capacity_bytes)
    except Exception:
        return 64 * 1024 * 1024  # conservative (v7x) fallback


def _pick_batch_tile(B):
    """Pad B to sublane multiple and pick a batch tile.

    Gives the 'parallel' grid axis extent >= 2 whenever B allows so v7x's two
    TensorCores can shard the batch; large B uses 256-row tiles (MXU-sized).
    Returns (padded_B, batch_tile).
    """
    Bp = _round_up(B, 8)
    if Bp <= 8:
        return Bp, Bp
    if Bp >= 512:
        bt = 256
    else:
        bt = _round_up(pl.cdiv(Bp, 2), 8)
    return _round_up(Bp, bt), bt


def _pick_time_chunk(T, bt, D, H, x_bytes, w_bytes, vmem_budget):
    """Largest tt (<=32, <=T) whose working set fits the VMEM budget."""
    fixed = (2 * (D * H + H * H) * w_bytes   # resident W_ih^T / W_hh^T (double-buffered)
             + 2 * H * 4                     # folded bias
             + bt * H * 4                    # carried-h scratch
             + 2 * bt * H * 4)               # h_last output block (double-buffered)
    per_tt = 2 * bt * D * x_bytes + bt * H * 4   # x chunk (x2) + gates scratch row
    tt = (vmem_budget - fixed) // max(per_tt, 1)
    return int(max(1, min(32, tt, T)))


# ---------------------------------------------------------------------------
# Fused recurrence kernel
# ---------------------------------------------------------------------------
def _rnn_fused_kernel(x_ref, wih_t_ref, whh_t_ref, b_ref, h_last_ref,
                      gates_vmem, h_vmem, *, tt, seq_len, compute_dtype):
    """One (batch-tile, time-chunk) grid step.

    Phase A: gates_i = x_i @ W_ih^T + (b_ih + b_hh)   for the tt chunk steps
             (hoisted out of the serial loop into VMEM scratch).
    Phase B: h_i = tanh(gates_i + h_{i-1} @ W_hh^T), predicated on i < T so a
             remainder chunk does not advance h on padded steps.
    h is carried across time chunks (inner, "arbitrary" axis) in VMEM scratch.
    """
    c = pl.program_id(1)                       # time-chunk index (inner axis)

    @pl.when(c == 0)                           # h_0 = 0 at start of each batch tile
    def _():
        h_vmem[...] = jnp.zeros_like(h_vmem)

    # --- Phase A: chunk input projection (independent of h, off the serial
    # critical path).  Static per-row loop: tt <= 32, static slices are free.
    for i in range(tt):
        gates_vmem[i] = (
            jnp.dot(x_ref[i], wih_t_ref[...],
                    preferred_element_type=jnp.float32)
            + b_ref[...])

    # --- Phase B: serial recurrence. W_hh^T is read from its ref inside each
    # step (never held live in vregs across the unrolled loop).
    t_base = c * tt

    def step(i, h):
        pre = gates_vmem[i] + jnp.dot(
            h.astype(compute_dtype), whh_t_ref[...],
            preferred_element_type=jnp.float32)
        h_new = jnp.tanh(pre)
        return jnp.where(t_base + i < seq_len, h_new, h)   # remainder guard

    h = jax.lax.fori_loop(0, tt, step, h_vmem[...], unroll=True)
    h_vmem[...] = h

    @pl.when(c == pl.num_programs(1) - 1)      # last chunk: emit h_T
    def _():
        h_last_ref[...] = h.astype(h_last_ref.dtype)


# ---------------------------------------------------------------------------
# Wrapper
# ---------------------------------------------------------------------------
def vanilla_rnn_forward(x, params, *, time_chunk=None, compute_dtype=None):
    """x: (B, T, D) float32 (batch_first, like nn.RNN(batch_first=True)).

    Returns (B, O) = fc(rnn(x)[:, -1, :]) with h0 = 0.
    """
    B, T, D = x.shape
    H = params["w_hh"].shape[0]

    # bf16 matmul operands (f32 accumulate + f32 tanh) once H is MXU-sized;
    # f32 for tiny H keeps bit-tight agreement with the f32 reference.
    if compute_dtype is None:
        compute_dtype = jnp.bfloat16 if H >= 256 else jnp.float32
    cdt = jnp.dtype(compute_dtype)

    Bp, bt = _pick_batch_tile(B)
    nb = Bp // bt

    vmem_cap = _vmem_capacity_bytes()
    if time_chunk is None:
        tt = _pick_time_chunk(T, bt, D, H, cdt.itemsize, cdt.itemsize,
                              int(0.4 * vmem_cap))
    else:
        tt = int(max(1, min(time_chunk, T)))
    nc = pl.cdiv(T, tt)
    Tp = nc * tt

    # Weights / folded bias.
    wih_t = params["w_ih"].T.astype(cdt)                              # (D, H)
    whh_t = params["w_hh"].T.astype(cdt)                              # (H, H)
    b = (params["b_ih"].astype(jnp.float32)
         + params["b_hh"].astype(jnp.float32)).reshape(1, H)          # (1, H)

    # Time-major x, zero-padded to (Tp, Bp, D) so every block is in-bounds
    # (padded timesteps are predicated off inside the kernel; padded batch
    # rows are sliced off below).
    x_tm = jnp.transpose(x, (1, 0, 2)).astype(cdt)
    x_tm = jnp.pad(x_tm, ((0, Tp - T), (0, Bp - B), (0, 0)))

    # Explicit VMEM budget for this pallas_call (sized from the actual tiles,
    # with headroom, never above physical capacity).
    needed = (2 * tt * bt * D * cdt.itemsize          # x chunk, double-buffered
              + 2 * (D * H + H * H) * cdt.itemsize    # weights
              + 2 * H * 4                             # bias
              + tt * bt * H * 4                       # gates scratch
              + bt * H * 4                            # carried h
              + 2 * bt * H * 4)                       # h_last out block
    vmem_limit = int(min(vmem_cap, max(2 * needed + (8 << 20), 32 << 20)))

    h_last = pl.pallas_call(
        functools.partial(_rnn_fused_kernel, tt=tt, seq_len=T,
                          compute_dtype=cdt),
        out_shape=jax.ShapeDtypeStruct((Bp, H), jnp.float32),
        grid_spec=pltpu.PrefetchScalarGridSpec(
            num_scalar_prefetch=0,
            grid=(nb, nc),                              # (batch tiles, time chunks)
            in_specs=[
                # x chunk (tt, bt, D): bt is a sublane multiple, D full-dim.
                pl.BlockSpec((tt, bt, D), lambda bi, c: (c, bi, 0)),
                # resident weights / bias, constant across the grid.
                pl.BlockSpec((D, H), lambda bi, c: (0, 0)),
                pl.BlockSpec((H, H), lambda bi, c: (0, 0)),
                pl.BlockSpec((1, H), lambda bi, c: (0, 0)),
            ],
            out_specs=pl.BlockSpec((bt, H), lambda bi, c: (bi, 0)),
            scratch_shapes=[
                pltpu.VMEM((tt, bt, H), jnp.float32),   # chunk gates
                pltpu.VMEM((bt, H), jnp.float32),       # carried hidden state
            ],
        ),
        compiler_params=pltpu.CompilerParams(
            dimension_semantics=("parallel", "arbitrary"),
            vmem_limit_bytes=vmem_limit),
    )(x_tm, wih_t, whh_t, b)

    h_last = h_last[:B]

    # fc head: tiny (B,H)@(H,O=1); left to XLA (avoids O=1 masked store and a
    # sequence-long VMEM-resident W_fc in the kernel).
    y = h_last @ params["w_fc"].T.astype(jnp.float32) + params["b_fc"]
    return y.astype(x.dtype)


# ---------------------------------------------------------------------------
# Pure-JAX reference + init
# ---------------------------------------------------------------------------
def _reference_forward(x, params):
    """Mirrors torch nn.RNN(tanh, batch_first=True) + Linear, h0 = 0."""
    B = x.shape[0]
    H = params["w_hh"].shape[0]

    def step(h, x_t):
        h_new = jnp.tanh(x_t @ params["w_ih"].T + params["b_ih"]
                         + h @ params["w_hh"].T + params["b_hh"])
        return h_new, None

    h0 = jnp.zeros((B, H), jnp.float32)
    h_last, _ = jax.lax.scan(step, h0, jnp.swapaxes(x, 0, 1))
    return h_last @ params["w_fc"].T + params["b_fc"]


def init_params(key, input_dim, hidden_dim, output_dim):
    """Deterministic init matching PyTorch's U(-1/sqrt(H), 1/sqrt(H)) scheme."""
    ks = jax.random.split(key, 6)
    k_rnn = 1.0 / jnp.sqrt(hidden_dim)
    k_fc = 1.0 / jnp.sqrt(hidden_dim)
    u = lambda k, shape, bnd: jax.random.uniform(k, shape, jnp.float32, -bnd, bnd)
    return {
        "w_ih": u(ks[0], (hidden_dim, input_dim), k_rnn),
        "w_hh": u(ks[1], (hidden_dim, hidden_dim), k_rnn),
        "b_ih": u(ks[2], (hidden_dim,), k_rnn),
        "b_hh": u(ks[3], (hidden_dim,), k_rnn),
        "w_fc": u(ks[4], (output_dim, hidden_dim), k_fc),
        "b_fc": u(ks[5], (output_dim,), k_fc),
    }


if __name__ == "__main__":
    D, H, O = 3, 32, 1   # input_dim, hidden_dim, output_dim

    key = jax.random.PRNGKey(0)
    k_x1, k_x2, k_x3, k_p = jax.random.split(key, 4)
    params = init_params(k_p, D, H, O)

    # --- Config 1: B=2, T=8 (single chunk, single batch tile). -------------
    x1 = jax.random.normal(k_x1, (2, 8, D), jnp.float32)
    ref1 = _reference_forward(x1, params)
    out1 = jax.block_until_ready(vanilla_rnn_forward(x1, params))
    assert out1.shape == (2, O), out1.shape
    assert jnp.allclose(out1, ref1, atol=1e-5, rtol=1e-5), (out1, ref1)

    # Same config, forced small chunks: exercises the cross-chunk h carry.
    out1c = jax.block_until_ready(vanilla_rnn_forward(x1, params, time_chunk=2))
    assert jnp.allclose(out1c, ref1, atol=1e-5, rtol=1e-5), (out1c, ref1)

    # --- Config 2: B=3, T=7 with time_chunk=3 (remainder chunk + B padding).
    x2 = jax.random.normal(k_x2, (3, 7, D), jnp.float32)
    ref2 = _reference_forward(x2, params)
    out2 = jax.block_until_ready(vanilla_rnn_forward(x2, params, time_chunk=3))
    assert out2.shape == (3, O), out2.shape
    assert jnp.allclose(out2, ref2, atol=1e-5, rtol=1e-5), (out2, ref2)

    # --- Config 3: B=10, T=5 (two batch tiles on the 'parallel' axis). ------
    x3 = jax.random.normal(k_x3, (10, 5, D), jnp.float32)
    ref3 = _reference_forward(x3, params)
    out3 = jax.block_until_ready(vanilla_rnn_forward(x3, params))
    assert out3.shape == (10, O), out3.shape
    assert jnp.allclose(out3, ref3, atol=1e-5, rtol=1e-5), (out3, ref3)

    print("KERNEL_OK")
</pallas_src>

<mosaic_0001>
module attributes {stable_mosaic.version = 11 : i64} {
  func.func @_rnn_fused_kernel(%arg0: i32, %arg1: i32, %arg2: memref<8x8x3xf32, #tpu.memory_space<vmem>>, %arg3: memref<3x32xf32, #tpu.memory_space<vmem>>, %arg4: memref<32x32xf32, #tpu.memory_space<vmem>>, %arg5: memref<1x32xf32, #tpu.memory_space<vmem>>, %arg6: memref<8x32xf32, #tpu.memory_space<vmem>>, %arg7: memref<8x8x32xf32, #tpu.memory_space<vmem>>, %arg8: memref<8x32xf32, #tpu.memory_space<vmem>>) attributes {dimension_semantics = [#tpu.dimension_semantics<parallel>, #tpu.dimension_semantics<arbitrary>], iteration_bounds = array<i64: 1, 1>, scalar_prefetch = 0 : i64, scratch_operands = 2 : i64, tpu.core_type = #tpu.core_type<tc>, window_params = [{transform_indices = @transform_0, window_bounds = array<i64: 8, 8, 3>}, {pipeline_mode = #tpu.pipeline_mode<synchronous>, transform_indices = @transform_1, window_bounds = array<i64: 3, 32>}, {pipeline_mode = #tpu.pipeline_mode<synchronous>, transform_indices = @transform_2, window_bounds = array<i64: 32, 32>}, {pipeline_mode = #tpu.pipeline_mode<synchronous>, transform_indices = @transform_3, window_bounds = array<i64: 1, 32>}, {transform_indices = @transform_4, window_bounds = array<i64: 8, 32>}]} {
    %c0_i32 = arith.constant 0 : i32
    %0 = arith.cmpi eq, %arg1, %c0_i32 : i32
    %1 = arith.extui %0 : i1 to i32
    %c0_i32_0 = arith.constant 0 : i32
    %2 = arith.cmpi ne, %1, %c0_i32_0 : i32
    scf.if %2 {
      %cst_136 = arith.constant 0.000000e+00 : f32
      %169 = vector.broadcast %cst_136 : f32 to vector<8x32xf32>
      %c0_137 = arith.constant 0 : index
      %c0_138 = arith.constant 0 : index
      %170 = vector.load %arg8[%c0_137, %c0_138] : memref<8x32xf32, #tpu.memory_space<vmem>>, vector<8x32xf32>
      tpu.vector_store %arg8[%c0_137, %c0_138], %169 {strides = array<i32>} : memref<8x32xf32, #tpu.memory_space<vmem>>, vector<8x32xf32>,
    } else {
    }
    %c0 = arith.constant 0 : index
    %c0_1 = arith.constant 0 : index
    %c0_2 = arith.constant 0 : index
    %3 = vector.load %arg2[%c0, %c0_1, %c0_2] : memref<8x8x3xf32, #tpu.memory_space<vmem>>, vector<1x8x3xf32>
    %4 = vector.shape_cast %3 : vector<1x8x3xf32> to vector<8x3xf32>
    %c0_3 = arith.constant 0 : index
    %c0_4 = arith.constant 0 : index
    %5 = vector.load %arg3[%c0_3, %c0_4] : memref<3x32xf32, #tpu.memory_space<vmem>>, vector<3x32xf32>
    %cst = arith.constant dense<0.000000e+00> : vector<8x32xf32>
    %6 = tpu.matmul %4, %5, %cst {dimension_numbers = #tpu.dot_dimension_numbers<[1], [0], [0], [1], [0, 0, 1, 1], [], []>} : vector<8x3xf32>, vector<3x32xf32>, vector<8x32xf32> -> vector<8x32xf32>
    %c0_5 = arith.constant 0 : index
    %c0_6 = arith.constant 0 : index
    %7 = vector.load %arg5[%c0_5, %c0_6] : memref<1x32xf32, #tpu.memory_space<vmem>>, vector<1x32xf32>
    %8 = vector.broadcast %7 : vector<1x32xf32> to vector<8x32xf32>
    %9 = arith.addf %6, %8 : vector<8x32xf32>
    %c0_7 = arith.constant 0 : index
    %c0_8 = arith.constant 0 : index
    %c0_9 = arith.constant 0 : index
    %10 = vector.load %arg7[%c0_7, %c0_8, %c0_9] : memref<8x8x32xf32, #tpu.memory_space<vmem>>, vector<1x8x32xf32>
    %11 = vector.shape_cast %10 : vector<1x8x32xf32> to vector<8x32xf32>
    %12 = vector.shape_cast %9 : vector<8x32xf32> to vector<1x8x32xf32>
    tpu.vector_store %arg7[%c0_7, %c0_8, %c0_9], %12 {strides = array<i32>} : memref<8x8x32xf32, #tpu.memory_space<vmem>>, vector<1x8x32xf32>,
    %c1 = arith.constant 1 : index
    %c0_10 = arith.constant 0 : index
    %c0_11 = arith.constant 0 : index
    %13 = vector.load %arg2[%c1, %c0_10, %c0_11] : memref<8x8x3xf32, #tpu.memory_space<vmem>>, vector<1x8x3xf32>
    %14 = vector.shape_cast %13 : vector<1x8x3xf32> to vector<8x3xf32>
    %c0_12 = arith.constant 0 : index
    %c0_13 = arith.constant 0 : index
    %15 = vector.load %arg3[%c0_12, %c0_13] : memref<3x32xf32, #tpu.memory_space<vmem>>, vector<3x32xf32>
    %cst_14 = arith.constant dense<0.000000e+00> : vector<8x32xf32>
    %16 = tpu.matmul %14, %15, %cst_14 {dimension_numbers = #tpu.dot_dimension_numbers<[1], [0], [0], [1], [0, 0, 1, 1], [], []>} : vector<8x3xf32>, vector<3x32xf32>, vector<8x32xf32> -> vector<8x32xf32>
    %c0_15 = arith.constant 0 : index
    %c0_16 = arith.constant 0 : index
    %17 = vector.load %arg5[%c0_15, %c0_16] : memref<1x32xf32, #tpu.memory_space<vmem>>, vector<1x32xf32>
    %18 = vector.broadcast %17 : vector<1x32xf32> to vector<8x32xf32>
    %19 = arith.addf %16, %18 : vector<8x32xf32>
    %c1_17 = arith.constant 1 : index
    %c0_18 = arith.constant 0 : index
    %c0_19 = arith.constant 0 : index
    %20 = vector.load %arg7[%c1_17, %c0_18, %c0_19] : memref<8x8x32xf32, #tpu.memory_space<vmem>>, vector<1x8x32xf32>
    %21 = vector.shape_cast %20 : vector<1x8x32xf32> to vector<8x32xf32>
    %22 = vector.shape_cast %19 : vector<8x32xf32> to vector<1x8x32xf32>
    tpu.vector_store %arg7[%c1_17, %c0_18, %c0_19], %22 {strides = array<i32>} : memref<8x8x32xf32, #tpu.memory_space<vmem>>, vector<1x8x32xf32>,
    %c2 = arith.constant 2 : index
    %c0_20 = arith.constant 0 : index
    %c0_21 = arith.constant 0 : index
    %23 = vector.load %arg2[%c2, %c0_20, %c0_21] : memref<8x8x3xf32, #tpu.memory_space<vmem>>, vector<1x8x3xf32>
    %24 = vector.shape_cast %23 : vector<1x8x3xf32> to vector<8x3xf32>
    %c0_22 = arith.constant 0 : index
    %c0_23 = arith.constant 0 : index
    %25 = vector.load %arg3[%c0_22, %c0_23] : memref<3x32xf32, #tpu.memory_space<vmem>>, vector<3x32xf32>
    %cst_24 = arith.constant dense<0.000000e+00> : vector<8x32xf32>
    %26 = tpu.matmul %24, %25, %cst_24 {dimension_numbers = #tpu.dot_dimension_numbers<[1], [0], [0], [1], [0, 0, 1, 1], [], []>} : vector<8x3xf32>, vector<3x32xf32>, vector<8x32xf32> -> vector<8x32xf32>
    %c0_25 = arith.constant 0 : index
    %c0_26 = arith.constant 0 : index
    %27 = vector.load %arg5[%c0_25, %c0_26] : memref<1x32xf32, #tpu.memory_space<vmem>>, vector<1x32xf32>
    %28 = vector.broadcast %27 : vector<1x32xf32> to vector<8x32xf32>
    %29 = arith.addf %26, %28 : vector<8x32xf32>
    %c2_27 = arith.constant 2 : index
    %c0_28 = arith.constant 0 : index
    %c0_29 = arith.constant 0 : index
    %30 = vector.load %arg7[%c2_27, %c0_28, %c0_29] : memref<8x8x32xf32, #tpu.memory_space<vmem>>, vector<1x8x32xf32>
    %31 = vector.shape_cast %30 : vector<1x8x32xf32> to vector<8x32xf32>
    %32 = vector.shape_cast %29 : vector<8x32xf32> to vector<1x8x32xf32>
    tpu.vector_store %arg7[%c2_27, %c0_28, %c0_29], %32 {strides = array<i32>} : memref<8x8x32xf32, #tpu.memory_space<vmem>>, vector<1x8x32xf32>,
    %c3 = arith.constant 3 : index
    %c0_30 = arith.constant 0 : index
    %c0_31 = arith.constant 0 : index
    %33 = vector.load %arg2[%c3, %c0_30, %c0_31] : memref<8x8x3xf32, #tpu.memory_space<vmem>>, vector<1x8x3xf32>
    %34 = vector.shape_cast %33 : vector<1x8x3xf32> to vector<8x3xf32>
    %c0_32 = arith.constant 0 : index
    %c0_33 = arith.constant 0 : index
    %35 = vector.load %arg3[%c0_32, %c0_33] : memref<3x32xf32, #tpu.memory_space<vmem>>, vector<3x32xf32>
    %cst_34 = arith.constant dense<0.000000e+00> : vector<8x32xf32>
    %36 = tpu.matmul %34, %35, %cst_34 {dimension_numbers = #tpu.dot_dimension_numbers<[1], [0], [0], [1], [0, 0, 1, 1], [], []>} : vector<8x3xf32>, vector<3x32xf32>, vector<8x32xf32> -> vector<8x32xf32>
    %c0_35 = arith.constant 0 : index
    %c0_36 = arith.constant 0 : index
    %37 = vector.load %arg5[%c0_35, %c0_36] : memref<1x32xf32, #tpu.memory_space<vmem>>, vector<1x32xf32>
    %38 = vector.broadcast %37 : vector<1x32xf32> to vector<8x32xf32>
    %39 = arith.addf %36, %38 : vector<8x32xf32>
    %c3_37 = arith.constant 3 : index
    %c0_38 = arith.constant 0 : index
    %c0_39 = arith.constant 0 : index
    %40 = vector.load %arg7[%c3_37, %c0_38, %c0_39] : memref<8x8x32xf32, #tpu.memory_space<vmem>>, vector<1x8x32xf32>
    %41 = vector.shape_cast %40 : vector<1x8x32xf32> to vector<8x32xf32>
    %42 = vector.shape_cast %39 : vector<8x32xf32> to vector<1x8x32xf32>
    tpu.vector_store %arg7[%c3_37, %c0_38, %c0_39], %42 {strides = array<i32>} : memref<8x8x32xf32, #tpu.memory_space<vmem>>, vector<1x8x32xf32>,
    %c4 = arith.constant 4 : index
    %c0_40 = arith.constant 0 : index
    %c0_41 = arith.constant 0 : index
    %43 = vector.load %arg2[%c4, %c0_40, %c0_41] : memref<8x8x3xf32, #tpu.memory_space<vmem>>, vector<1x8x3xf32>
    %44 = vector.shape_cast %43 : vector<1x8x3xf32> to vector<8x3xf32>
    %c0_42 = arith.constant 0 : index
    %c0_43 = arith.constant 0 : index
    %45 = vector.load %arg3[%c0_42, %c0_43] : memref<3x32xf32, #tpu.memory_space<vmem>>, vector<3x32xf32>
    %cst_44 = arith.constant dense<0.000000e+00> : vector<8x32xf32>
    %46 = tpu.matmul %44, %45, %cst_44 {dimension_numbers = #tpu.dot_dimension_numbers<[1], [0], [0], [1], [0, 0, 1, 1], [], []>} : vector<8x3xf32>, vector<3x32xf32>, vector<8x32xf32> -> vector<8x32xf32>
    %c0_45 = arith.constant 0 : index
    %c0_46 = arith.constant 0 : index
    %47 = vector.load %arg5[%c0_45, %c0_46] : memref<1x32xf32, #tpu.memory_space<vmem>>, vector<1x32xf32>
    %48 = vector.broadcast %47 : vector<1x32xf32> to vector<8x32xf32>
    %49 = arith.addf %46, %48 : vector<8x32xf32>
    %c4_47 = arith.constant 4 : index
    %c0_48 = arith.constant 0 : index
    %c0_49 = arith.constant 0 : index
    %50 = vector.load %arg7[%c4_47, %c0_48, %c0_49] : memref<8x8x32xf32, #tpu.memory_space<vmem>>, vector<1x8x32xf32>
    %51 = vector.shape_cast %50 : vector<1x8x32xf32> to vector<8x32xf32>
    %52 = vector.shape_cast %49 : vector<8x32xf32> to vector<1x8x32xf32>
    tpu.vector_store %arg7[%c4_47, %c0_48, %c0_49], %52 {strides = array<i32>} : memref<8x8x32xf32, #tpu.memory_space<vmem>>, vector<1x8x32xf32>,
    %c5 = arith.constant 5 : index
    %c0_50 = arith.constant 0 : index
    %c0_51 = arith.constant 0 : index
    %53 = vector.load %arg2[%c5, %c0_50, %c0_51] : memref<8x8x3xf32, #tpu.memory_space<vmem>>, vector<1x8x3xf32>
    %54 = vector.shape_cast %53 : vector<1x8x3xf32> to vector<8x3xf32>
    %c0_52 = arith.constant 0 : index
    %c0_53 = arith.constant 0 : index
    %55 = vector.load %arg3[%c0_52, %c0_53] : memref<3x32xf32, #tpu.memory_space<vmem>>, vector<3x32xf32>
    %cst_54 = arith.constant dense<0.000000e+00> : vector<8x32xf32>
    %56 = tpu.matmul %54, %55, %cst_54 {dimension_numbers = #tpu.dot_dimension_numbers<[1], [0], [0], [1], [0, 0, 1, 1], [], []>} : vector<8x3xf32>, vector<3x32xf32>, vector<8x32xf32> -> vector<8x32xf32>
    %c0_55 = arith.constant 0 : index
    %c0_56 = arith.constant 0 : index
    %57 = vector.load %arg5[%c0_55, %c0_56] : memref<1x32xf32, #tpu.memory_space<vmem>>, vector<1x32xf32>
    %58 = vector.broadcast %57 : vector<1x32xf32> to vector<8x32xf32>
    %59 = arith.addf %56, %58 : vector<8x32xf32>
    %c5_57 = arith.constant 5 : index
    %c0_58 = arith.constant 0 : index
    %c0_59 = arith.constant 0 : index
    %60 = vector.load %arg7[%c5_57, %c0_58, %c0_59] : memref<8x8x32xf32, #tpu.memory_space<vmem>>, vector<1x8x32xf32>
    %61 = vector.shape_cast %60 : vector<1x8x32xf32> to vector<8x32xf32>
    %62 = vector.shape_cast %59 : vector<8x32xf32> to vector<1x8x32xf32>
    tpu.vector_store %arg7[%c5_57, %c0_58, %c0_59], %62 {strides = array<i32>} : memref<8x8x32xf32, #tpu.memory_space<vmem>>, vector<1x8x32xf32>,
    %c6 = arith.constant 6 : index
    %c0_60 = arith.constant 0 : index
    %c0_61 = arith.constant 0 : index
    %63 = vector.load %arg2[%c6, %c0_60, %c0_61] : memref<8x8x3xf32, #tpu.memory_space<vmem>>, vector<1x8x3xf32>
    %64 = vector.shape_cast %63 : vector<1x8x3xf32> to vector<8x3xf32>
    %c0_62 = arith.constant 0 : index
    %c0_63 = arith.constant 0 : index
    %65 = vector.load %arg3[%c0_62, %c0_63] : memref<3x32xf32, #tpu.memory_space<vmem>>, vector<3x32xf32>
    %cst_64 = arith.constant dense<0.000000e+00> : vector<8x32xf32>
    %66 = tpu.matmul %64, %65, %cst_64 {dimension_numbers = #tpu.dot_dimension_numbers<[1], [0], [0], [1], [0, 0, 1, 1], [], []>} : vector<8x3xf32>, vector<3x32xf32>, vector<8x32xf32> -> vector<8x32xf32>
    %c0_65 = arith.constant 0 : index
    %c0_66 = arith.constant 0 : index
    %67 = vector.load %arg5[%c0_65, %c0_66] : memref<1x32xf32, #tpu.memory_space<vmem>>, vector<1x32xf32>
    %68 = vector.broadcast %67 : vector<1x32xf32> to vector<8x32xf32>
    %69 = arith.addf %66, %68 : vector<8x32xf32>
    %c6_67 = arith.constant 6 : index
    %c0_68 = arith.constant 0 : index
    %c0_69 = arith.constant 0 : index
    %70 = vector.load %arg7[%c6_67, %c0_68, %c0_69] : memref<8x8x32xf32, #tpu.memory_space<vmem>>, vector<1x8x32xf32>
    %71 = vector.shape_cast %70 : vector<1x8x32xf32> to vector<8x32xf32>
    %72 = vector.shape_cast %69 : vector<8x32xf32> to vector<1x8x32xf32>
    tpu.vector_store %arg7[%c6_67, %c0_68, %c0_69], %72 {strides = array<i32>} : memref<8x8x32xf32, #tpu.memory_space<vmem>>, vector<1x8x32xf32>,
    %c7 = arith.constant 7 : index
    %c0_70 = arith.constant 0 : index
    %c0_71 = arith.constant 0 : index
    %73 = vector.load %arg2[%c7, %c0_70, %c0_71] : memref<8x8x3xf32, #tpu.memory_space<vmem>>, vector<1x8x3xf32>
    %74 = vector.shape_cast %73 : vector<1x8x3xf32> to vector<8x3xf32>
    %c0_72 = arith.constant 0 : index
    %c0_73 = arith.constant 0 : index
    %75 = vector.load %arg3[%c0_72, %c0_73] : memref<3x32xf32, #tpu.memory_space<vmem>>, vector<3x32xf32>
    %cst_74 = arith.constant dense<0.000000e+00> : vector<8x32xf32>
    %76 = tpu.matmul %74, %75, %cst_74 {dimension_numbers = #tpu.dot_dimension_numbers<[1], [0], [0], [1], [0, 0, 1, 1], [], []>} : vector<8x3xf32>, vector<3x32xf32>, vector<8x32xf32> -> vector<8x32xf32>
    %c0_75 = arith.constant 0 : index
    %c0_76 = arith.constant 0 : index
    %77 = vector.load %arg5[%c0_75, %c0_76] : memref<1x32xf32, #tpu.memory_space<vmem>>, vector<1x32xf32>
    %78 = vector.broadcast %77 : vector<1x32xf32> to vector<8x32xf32>
    %79 = arith.addf %76, %78 : vector<8x32xf32>
    %c7_77 = arith.constant 7 : index
    %c0_78 = arith.constant 0 : index
    %c0_79 = arith.constant 0 : index
    %80 = vector.load %arg7[%c7_77, %c0_78, %c0_79] : memref<8x8x32xf32, #tpu.memory_space<vmem>>, vector<1x8x32xf32>
    %81 = vector.shape_cast %80 : vector<1x8x32xf32> to vector<8x32xf32>
    %82 = vector.shape_cast %79 : vector<8x32xf32> to vector<1x8x32xf32>
    tpu.vector_store %arg7[%c7_77, %c0_78, %c0_79], %82 {strides = array<i32>} : memref<8x8x32xf32, #tpu.memory_space<vmem>>, vector<1x8x32xf32>,
    %c8_i32 = arith.constant 8 : i32
    %83 = arith.muli %arg1, %c8_i32 : i32
    %c0_80 = arith.constant 0 : index
    %c0_81 = arith.constant 0 : index
    %84 = vector.load %arg8[%c0_80, %c0_81] : memref<8x32xf32, #tpu.memory_space<vmem>>, vector<8x32xf32>
    %c0_i32_82 = arith.constant 0 : i32
    %85 = arith.index_cast %c0_i32_82 : i32 to index
    %c0_83 = arith.constant 0 : index
    %c0_84 = arith.constant 0 : index
    %86 = vector.load %arg7[%85, %c0_83, %c0_84] : memref<8x8x32xf32, #tpu.memory_space<vmem>>, vector<1x8x32xf32>
    %87 = vector.shape_cast %86 : vector<1x8x32xf32> to vector<8x32xf32>
    %c0_85 = arith.constant 0 : index
    %c0_86 = arith.constant 0 : index
    %88 = vector.load %arg4[%c0_85, %c0_86] : memref<32x32xf32, #tpu.memory_space<vmem>>, vector<32x32xf32>
    %cst_87 = arith.constant dense<0.000000e+00> : vector<8x32xf32>
    %89 = tpu.matmul %84, %88, %cst_87 {dimension_numbers = #tpu.dot_dimension_numbers<[1], [0], [0], [1], [0, 0, 1, 1], [], []>} : vector<8x32xf32>, vector<32x32xf32>, vector<8x32xf32> -> vector<8x32xf32>
    %90 = arith.addf %87, %89 : vector<8x32xf32>
    %91 = math.tanh %90 : vector<8x32xf32>
    %92 = arith.addi %83, %c0_i32_82 : i32
    %c8_i32_88 = arith.constant 8 : i32
    %93 = arith.cmpi slt, %92, %c8_i32_88 : i32
    %94 = arith.select %93, %91, %84 : vector<8x32xf32>
    %c1_i32 = arith.constant 1 : i32
    %95 = arith.index_cast %c1_i32 : i32 to index
    %c0_89 = arith.constant 0 : index
    %c0_90 = arith.constant 0 : index
    %96 = vector.load %arg7[%95, %c0_89, %c0_90] : memref<8x8x32xf32, #tpu.memory_space<vmem>>, vector<1x8x32xf32>
    %97 = vector.shape_cast %96 : vector<1x8x32xf32> to vector<8x32xf32>
    %c0_91 = arith.constant 0 : index
    %c0_92 = arith.constant 0 : index
    %98 = vector.load %arg4[%c0_91, %c0_92] : memref<32x32xf32, #tpu.memory_space<vmem>>, vector<32x32xf32>
    %cst_93 = arith.constant dense<0.000000e+00> : vector<8x32xf32>
    %99 = tpu.matmul %94, %98, %cst_93 {dimension_numbers = #tpu.dot_dimension_numbers<[1], [0], [0], [1], [0, 0, 1, 1], [], []>} : vector<8x32xf32>, vector<32x32xf32>, vector<8x32xf32> -> vector<8x32xf32>
    %100 = arith.addf %97, %99 : vector<8x32xf32>
    %101 = math.tanh %100 : vector<8x32xf32>
    %102 = arith.addi %83, %c1_i32 : i32
    %c8_i32_94 = arith.constant 8 : i32
    %103 = arith.cmpi slt, %102, %c8_i32_94 : i32
    %104 = arith.select %103, %101, %94 : vector<8x32xf32>
    %c2_i32 = arith.constant 2 : i32
    %105 = arith.index_cast %c2_i32 : i32 to index
    %c0_95 = arith.constant 0 : index
    %c0_96 = arith.constant 0 : index
    %106 = vector.load %arg7[%105, %c0_95, %c0_96] : memref<8x8x32xf32, #tpu.memory_space<vmem>>, vector<1x8x32xf32>
    %107 = vector.shape_cast %106 : vector<1x8x32xf32> to vector<8x32xf32>
    %c0_97 = arith.constant 0 : index
    %c0_98 = arith.constant 0 : index
    %108 = vector.load %arg4[%c0_97, %c0_98] : memref<32x32xf32, #tpu.memory_space<vmem>>, vector<32x32xf32>
    %cst_99 = arith.constant dense<0.000000e+00> : vector<8x32xf32>
    %109 = tpu.matmul %104, %108, %cst_99 {dimension_numbers = #tpu.dot_dimension_numbers<[1], [0], [0], [1], [0, 0, 1, 1], [], []>} : vector<8x32xf32>, vector<32x32xf32>, vector<8x32xf32> -> vector<8x32xf32>
    %110 = arith.addf %107, %109 : vector<8x32xf32>
    %111 = math.tanh %110 : vector<8x32xf32>
    %112 = arith.addi %83, %c2_i32 : i32
    %c8_i32_100 = arith.constant 8 : i32
    %113 = arith.cmpi slt, %112, %c8_i32_100 : i32
    %114 = arith.select %113, %111, %104 : vector<8x32xf32>
    %c3_i32 = arith.constant 3 : i32
    %115 = arith.index_cast %c3_i32 : i32 to index
    %c0_101 = arith.constant 0 : index
    %c0_102 = arith.constant 0 : index
    %116 = vector.load %arg7[%115, %c0_101, %c0_102] : memref<8x8x32xf32, #tpu.memory_space<vmem>>, vector<1x8x32xf32>
    %117 = vector.shape_cast %116 : vector<1x8x32xf32> to vector<8x32xf32>
    %c0_103 = arith.constant 0 : index
    %c0_104 = arith.constant 0 : index
    %118 = vector.load %arg4[%c0_103, %c0_104] : memref<32x32xf32, #tpu.memory_space<vmem>>, vector<32x32xf32>
    %cst_105 = arith.constant dense<0.000000e+00> : vector<8x32xf32>
    %119 = tpu.matmul %114, %118, %cst_105 {dimension_numbers = #tpu.dot_dimension_numbers<[1], [0], [0], [1], [0, 0, 1, 1], [], []>} : vector<8x32xf32>, vector<32x32xf32>, vector<8x32xf32> -> vector<8x32xf32>
    %120 = arith.addf %117, %119 : vector<8x32xf32>
    %121 = math.tanh %120 : vector<8x32xf32>
    %122 = arith.addi %83, %c3_i32 : i32
    %c8_i32_106 = arith.constant 8 : i32
    %123 = arith.cmpi slt, %122, %c8_i32_106 : i32
    %124 = arith.select %123, %121, %114 : vector<8x32xf32>
    %c4_i32 = arith.constant 4 : i32
    %125 = arith.index_cast %c4_i32 : i32 to index
    %c0_107 = arith.constant 0 : index
    %c0_108 = arith.constant 0 : index
    %126 = vector.load %arg7[%125, %c0_107, %c0_108] : memref<8x8x32xf32, #tpu.memory_space<vmem>>, vector<1x8x32xf32>
    %127 = vector.shape_cast %126 : vector<1x8x32xf32> to vector<8x32xf32>
    %c0_109 = arith.constant 0 : index
    %c0_110 = arith.constant 0 : index
    %128 = vector.load %arg4[%c0_109, %c0_110] : memref<32x32xf32, #tpu.memory_space<vmem>>, vector<32x32xf32>
    %cst_111 = arith.constant dense<0.000000e+00> : vector<8x32xf32>
    %129 = tpu.matmul %124, %128, %cst_111 {dimension_numbers = #tpu.dot_dimension_numbers<[1], [0], [0], [1], [0, 0, 1, 1], [], []>} : vector<8x32xf32>, vector<32x32xf32>, vector<8x32xf32> -> vector<8x32xf32>
    %130 = arith.addf %127, %129 : vector<8x32xf32>
    %131 = math.tanh %130 : vector<8x32xf32>
    %132 = arith.addi %83, %c4_i32 : i32
    %c8_i32_112 = arith.constant 8 : i32
    %133 = arith.cmpi slt, %132, %c8_i32_112 : i32
    %134 = arith.select %133, %131, %124 : vector<8x32xf32>
    %c5_i32 = arith.constant 5 : i32
    %135 = arith.index_cast %c5_i32 : i32 to index
    %c0_113 = arith.constant 0 : index
    %c0_114 = arith.constant 0 : index
    %136 = vector.load %arg7[%135, %c0_113, %c0_114] : memref<8x8x32xf32, #tpu.memory_space<vmem>>, vector<1x8x32xf32>
    %137 = vector.shape_cast %136 : vector<1x8x32xf32> to vector<8x32xf32>
    %c0_115 = arith.constant 0 : index
    %c0_116 = arith.constant 0 : index
    %138 = vector.load %arg4[%c0_115, %c0_116] : memref<32x32xf32, #tpu.memory_space<vmem>>, vector<32x32xf32>
    %cst_117 = arith.constant dense<0.000000e+00> : vector<8x32xf32>
    %139 = tpu.matmul %134, %138, %cst_117 {dimension_numbers = #tpu.dot_dimension_numbers<[1], [0], [0], [1], [0, 0, 1, 1], [], []>} : vector<8x32xf32>, vector<32x32xf32>, vector<8x32xf32> -> vector<8x32xf32>
    %140 = arith.addf %137, %139 : vector<8x32xf32>
    %141 = math.tanh %140 : vector<8x32xf32>
    %142 = arith.addi %83, %c5_i32 : i32
    %c8_i32_118 = arith.constant 8 : i32
    %143 = arith.cmpi slt, %142, %c8_i32_118 : i32
    %144 = arith.select %143, %141, %134 : vector<8x32xf32>
    %c6_i32 = arith.constant 6 : i32
    %145 = arith.index_cast %c6_i32 : i32 to index
    %c0_119 = arith.constant 0 : index
    %c0_120 = arith.constant 0 : index
    %146 = vector.load %arg7[%145, %c0_119, %c0_120] : memref<8x8x32xf32, #tpu.memory_space<vmem>>, vector<1x8x32xf32>
    %147 = vector.shape_cast %146 : vector<1x8x32xf32> to vector<8x32xf32>
    %c0_121 = arith.constant 0 : index
    %c0_122 = arith.constant 0 : index
    %148 = vector.load %arg4[%c0_121, %c0_122] : memref<32x32xf32, #tpu.memory_space<vmem>>, vector<32x32xf32>
    %cst_123 = arith.constant dense<0.000000e+00> : vector<8x32xf32>
    %149 = tpu.matmul %144, %148, %cst_123 {dimension_numbers = #tpu.dot_dimension_numbers<[1], [0], [0], [1], [0, 0, 1, 1], [], []>} : vector<8x32xf32>, vector<32x32xf32>, vector<8x32xf32> -> vector<8x32xf32>
    %150 = arith.addf %147, %149 : vector<8x32xf32>
    %151 = math.tanh %150 : vector<8x32xf32>
    %152 = arith.addi %83, %c6_i32 : i32
    %c8_i32_124 = arith.constant 8 : i32
    %153 = arith.cmpi slt, %152, %c8_i32_124 : i32
    %154 = arith.select %153, %151, %144 : vector<8x32xf32>
    %c7_i32 = arith.constant 7 : i32
    %155 = arith.index_cast %c7_i32 : i32 to index
    %c0_125 = arith.constant 0 : index
    %c0_126 = arith.constant 0 : index
    %156 = vector.load %arg7[%155, %c0_125, %c0_126] : memref<8x8x32xf32, #tpu.memory_space<vmem>>, vector<1x8x32xf32>
    %157 = vector.shape_cast %156 : vector<1x8x32xf32> to vector<8x32xf32>
    %c0_127 = arith.constant 0 : index
    %c0_128 = arith.constant 0 : index
    %158 = vector.load %arg4[%c0_127, %c0_128] : memref<32x32xf32, #tpu.memory_space<vmem>>, vector<32x32xf32>
    %cst_129 = arith.constant dense<0.000000e+00> : vector<8x32xf32>
    %159 = tpu.matmul %154, %158, %cst_129 {dimension_numbers = #tpu.dot_dimension_numbers<[1], [0], [0], [1], [0, 0, 1, 1], [], []>} : vector<8x32xf32>, vector<32x32xf32>, vector<8x32xf32> -> vector<8x32xf32>
    %160 = arith.addf %157, %159 : vector<8x32xf32>
    %161 = math.tanh %160 : vector<8x32xf32>
    %162 = arith.addi %83, %c7_i32 : i32
    %c8_i32_130 = arith.constant 8 : i32
    %163 = arith.cmpi slt, %162, %c8_i32_130 : i32
    %164 = arith.select %163, %161, %154 : vector<8x32xf32>
    %c8_i32_131 = arith.constant 8 : i32
    %c0_132 = arith.constant 0 : index
    %c0_133 = arith.constant 0 : index
    %165 = vector.load %arg8[%c0_132, %c0_133] : memref<8x32xf32, #tpu.memory_space<vmem>>, vector<8x32xf32>
    tpu.vector_store %arg8[%c0_132, %c0_133], %164 {strides = array<i32>} : memref<8x32xf32, #tpu.memory_space<vmem>>, vector<8x32xf32>,
    %c0_i32_134 = arith.constant 0 : i32
    %166 = arith.cmpi eq, %arg1, %c0_i32_134 : i32
    %167 = arith.extui %166 : i1 to i32
    %c0_i32_135 = arith.constant 0 : i32
    %168 = arith.cmpi ne, %167, %c0_i32_135 : i32
    scf.if %168 {
      %c0_136 = arith.constant 0 : index
      %c0_137 = arith.constant 0 : index
      %169 = vector.load %arg6[%c0_136, %c0_137] : memref<8x32xf32, #tpu.memory_space<vmem>>, vector<8x32xf32>
      tpu.vector_store %arg6[%c0_136, %c0_137], %164 {strides = array<i32>} : memref<8x32xf32, #tpu.memory_space<vmem>>, vector<8x32xf32>,
    } else {
    }
    return
  }
  func.func @transform_0(%arg0: i32, %arg1: i32) -> (i32, i32, i32) {
    %c0_i32 = arith.constant 0 : i32
    %c0_i32_0 = arith.constant 0 : i32
    return %arg1, %arg0, %c0_i32 : i32, i32, i32
  }
  func.func @transform_1(%arg0: i32, %arg1: i32) -> (i32, i32) {
    %c0_i32 = arith.constant 0 : i32
    %c0_i32_0 = arith.constant 0 : i32
    %c0_i32_1 = arith.constant 0 : i32
    return %c0_i32, %c0_i32_0 : i32, i32
  }
  func.func @transform_2(%arg0: i32, %arg1: i32) -> (i32, i32) {
    %c0_i32 = arith.constant 0 : i32
    %c0_i32_0 = arith.constant 0 : i32
    %c0_i32_1 = arith.constant 0 : i32
    return %c0_i32, %c0_i32_0 : i32, i32
  }
  func.func @transform_3(%arg0: i32, %arg1: i32) -> (i32, i32) {
    %c0_i32 = arith.constant 0 : i32
    %c0_i32_0 = arith.constant 0 : i32
    %c0_i32_1 = arith.constant 0 : i32
    return %c0_i32, %c0_i32_0 : i32, i32
  }
  func.func @transform_4(%arg0: i32, %arg1: i32) -> (i32, i32) {
    %c0_i32 = arith.constant 0 : i32
    %c0_i32_0 = arith.constant 0 : i32
    return %arg0, %c0_i32 : i32, i32
  }
}

</mosaic_0001>

<bundles_post_ra>
// kernel: tpu_custom_call.1
= control target key start
LH: loop header
LB: loop body
LE: loop exit
PB: predicated region body
PF: predicated region fallthrough
CT: control target
= control target key end

     0   :  { %vm37_vm0 = vcmask 1042432   ;;  %v1724_v2 = vmov 0.0   ;;  %vm1725_vm1 = vmmov 0   ;;  %vm33_vm2 = vcmask 23552   ;;  %s1940_s0 = inlined_call_operand.vmem [shape: f32[8,8,3], index: 0, kind: input, shape index: {}]   ;;  %s1941_s1 = inlined_call_operand.vmem [shape: f32[3,32], index: 1, kind: input, shape index: {}]   ;;  %s1942_s2 = inlined_call_operand.vmem [shape: f32[32,32], index: 2, kind: input, shape index: {}]   ;;  %s1943_s3 = inlined_call_operand.vmem [shape: f32[1,32], index: 3, kind: input, shape index: {}]   ;;  %s1944_s4 = inlined_call_operand.hbm [shape: f32[8,32], index: 4, kind: output, shape index: {}]  }
   0x1   :  { %v25_v0 = vld [vmem:[%s1941_s1] sm:$0x7]  ;;  %1504 = vmatprep.subr.mxu0 %v1724_v2  ;;  %1506 = vmatprep.mubr.msk.f32.mxu0 %vm1725_vm1, %v1724_v2  ;;  %vm22_vm3 = vcmask 261120   ;;  %v1416_v4 = vld [vmem:[%s1940_s0 + $0x10] sm:$0xff] }
   0x2   :  { %v24_v1 = vld [vmem:[%s1940_s0] sm:$0xff]  ;;  %1505 = vmatpush3.msk.msra.mxu0 %vm37_vm0, %v25_v0  ;;  %1509 = vmatprep.subr.mxu1 %v1724_v2  ;;  %23 = vst.msk [vmem:[#allocation3] sm:$0xff] %vm22_vm3, %v1724_v2 }
   0x3   :  { %v203_v3 = vld [vmem:[%s1941_s1] sm:$0x7]  ;;  %1507 = vmatmul.mubr.msk.f32.vlgmr.msra.gmra.mrb[0].mxu0 %vm33_vm2, %v24_v1  ;;  %1514 = vmatprep.subr.mxu0 %v1724_v2 }
   0x4   :  { %1515 = vmatpush3.msk.msra.mxu0 %vm37_vm0, %v203_v3  ;;  %1516 = vmatprep.mubr.msk.f32.mxu0 %vm1725_vm1, %v1724_v2 }
   0x5   :  { %9 = vsyncpa [#allocation5], 0  ;;  %1524 = vmatprep.subr.mxu0 %v1724_v2  ;;  %v379_v5 = vld [vmem:[%s1941_s1] sm:$0x7]  ;;  %1511 = vmatprep.mubr.msk.f32.mxu1 %vm1725_vm1, %v1724_v2  ;;  %v733_v9 = vld [vmem:[%s1942_s2 + $0x8] sm:$0xff]  ;;  %v1726_v12 = vmov 0.0|0.0  }
   0x6   :  { %v1424_v6 = vld [vmem:[%s1940_s0 + $0x20] sm:$0xff]  ;;  %v1432_v10 = vld [vmem:[%s1940_s0 + $0x30] sm:$0xff]  ;;  %v735_v14 = vld [vmem:[%s1942_s2 + $0x18] sm:$0xff] }
   0x7   :  { %1517 = vmatmul.mubr.msk.f32.vlgmr.msra.gmra.mrb[2].mxu0 %vm33_vm2, %v1416_v4  ;;  %v555_v7 = vld [vmem:[%s1941_s1] sm:$0x7]  ;;  %v734_v13 = vld [vmem:[%s1942_s2 + $0x10] sm:$0xff]  ;;  %v1412_v18 = vld [vmem:[%s1940_s0 + $0x8] sm:$0xff] }
   0x8   :  { %1525 = vmatpush3.msk.msra.mxu0 %vm37_vm0, %v379_v5  ;;  %1526 = vmatprep.mubr.msk.f32.mxu0 %vm1725_vm1, %v1724_v2  ;;  %v732_v8 = vld [vmem:[%s1942_s2] sm:$0xff]  ;;  %v1818_v15 = vpack.c.bf16 %v735_v14, %v734_v13  ;;  %v1420_v20 = vld [vmem:[%s1940_s0 + $0x18] sm:$0xff]  ;;  %v1428_v22 = vld [vmem:[%s1940_s0 + $0x28] sm:$0xff] }
   0x9   :  { %1534 = vmatprep.subr.mxu0 %v1724_v2  ;;  %v1807_v11 = vpack.c.bf16 %v733_v9, %v732_v8  ;;  %v730_v16 = vld [vmem:[#allocation3] sm:$0xff]  ;;  %v1436_v24 = vld [vmem:[%s1940_s0 + $0x38] sm:$0xff]  ;;  %s1727_s0 = smov [#allocation4]  }
   0xa   :  { %v115_v17 = vld [vmem:[%s1941_s1] sm:$0x7] }
   0xb   :  { %1527 = vmatmul.mubr.msk.f32.vlgmr.msra.gmra.mrb[4].mxu0 %vm33_vm2, %v1424_v6  ;;  %1510 = vmatpush3.msk.msra.mxu1 %vm37_vm0, %v115_v17  ;;  %v291_v19 = vld [vmem:[%s1941_s1] sm:$0x7] }
   0xc   :  { %1535 = vmatpush3.msk.msra.mxu0 %vm37_vm0, %v555_v7  ;;  %1536 = vmatprep.mubr.msk.f32.mxu0 %vm1725_vm1, %v1724_v2  ;;  %v467_v21 = vld [vmem:[%s1941_s1] sm:$0x7] }
   0xd   :  { %1632 = vmatprep.subr.bf16.mxu0 %v1726_v12  ;;  %1512 = vmatmul.mubr.msk.f32.vlgmr.msra.gmra.mrb[0].mxu1 %vm33_vm2, %v1412_v18  ;;  %v643_v23 = vld [vmem:[%s1941_s1] sm:$0x7] }
   0xe   :  { %1519 = vmatprep.subr.mxu1 %v1724_v2  ;;  %1521 = vmatprep.mubr.msk.f32.mxu1 %vm1725_vm1, %v1724_v2  ;;  %v1409_v25 = vld [vmem:[%s1943_s3] ss:$0 sm:$0xff]  ;;  %s1401_s3 = sshll.u32 %s1727_s0, 4  ;;  %s1402_s3 = int_to_ptr.vmem [resolvable:$true] %s1401_s3 }
   0xf   :  { %1537 = vmatmul.mubr.msk.f32.vlgmr.msra.gmra.mrb[6].mxu0 %vm33_vm2, %v1432_v10  ;;  %1520 = vmatpush3.msk.msra.mxu1 %vm37_vm0, %v291_v19  ;;  %s1700_s29 = scalar_lea.vmem %s1402_s3, 128  ;;  %p1705_p1 = scmp.lt.s32.totalorder %s1402_s3, %s1402_s3 }
  0x10   :  { %1634 = vmatpush3.bf16.msra.mxu0 %v1807_v11  ;;  %1552 = vmatprep.mubr.msk.f32.mxu0 %vm1725_vm1, %v1724_v2  ;;  %p1701_p0 = scmp.ne.s32.totalorder %s1402_s3, %s1700_s29  ;;  %p1706_p2 = scmp.lt.s32.totalorder %s1700_s29, %s1700_s29 }
  0x11   :  { %1635 = vmatprep.subr.bf16.mxu0 %v1726_v12  ;;  %1529 = vmatprep.subr.mxu1 %v1724_v2 }
  0x12   :  { %1522 = vmatmul.mubr.msk.f32.vlgmr.msra.gmra.mrb[2].mxu1 %vm33_vm2, %v1420_v20  ;;  %p1707_p3 = por %p1706_p2, %p1705_p1 }
  0x13   :  { %1530 = vmatpush3.msk.msra.mxu1 %vm37_vm0, %v467_v21  ;;  %1531 = vmatprep.mubr.msk.f32.mxu1 %vm1725_vm1, %v1724_v2 }
  0x14   :  { %1637 = vmatpush3.bf16.msra.mxu0 %v1818_v15  ;;  %1539 = vmatprep.subr.mxu1 %v1724_v2  ;;  %p1708_p4 = pnand %p1707_p3, %p1701_p0 }
  0x15   :  { %1644 = vmatprep.subr.bf16.mxu0 %v1726_v12 }
  0x16   :  { %1532 = vmatmul.mubr.msk.f32.vlgmr.msra.gmra.mrb[4].mxu1 %vm33_vm2, %v1428_v22 }
  0x17   :  { %1553 = vmatmul.mubr.msk.f32.vlgmr.msra.gmra.mrb[8].mxu0 %vm22_vm3, %v730_v16  ;;  %1541 = vmatprep.mubr.msk.f32.mxu1 %vm1725_vm1, %v1724_v2 }
  0x18   :  { %1646 = vmatpush3.bf16.msra.mxu0 %v1807_v11  ;;  %1574 = vmatprep.mubr.msk.f32.mxu0 %vm1725_vm1, %v1724_v2 }
  0x19   :  { %1647 = vmatprep.subr.bf16.mxu0 %v1726_v12  ;;  %1540 = vmatpush3.msk.msra.mxu1 %vm37_vm0, %v643_v23 }
  0x1a   :  { %1638 = vmatprep.subr.bf16.mxu1 %v1726_v12  ;;  %1542 = vmatmul.mubr.msk.f32.vlgmr.msra.gmra.mrb[6].mxu1 %vm33_vm2, %v1436_v24 }
  0x1b   :  { %1640 = vmatpush3.bf16.msra.mxu1 %v1807_v11  ;;  %1563 = vmatprep.mubr.msk.f32.mxu1 %vm1725_vm1, %v1724_v2 }
  0x1c   :  { %1649 = vmatpush3.bf16.msra.mxu0 %v1818_v15  ;;  %1641 = vmatprep.subr.bf16.mxu1 %v1726_v12 }
  0x1d   :  { %1656 = vmatprep.subr.bf16.mxu0 %v1726_v12 }
  0x1f   :  { %1643 = vmatpush3.bf16.msra.mxu1 %v1818_v15 }
  0x20   :  { %1650 = vmatprep.subr.bf16.mxu1 %v1726_v12 }
  0xd6   :  { %v107_v26 = vpop.f32.mrb[0].mxu0 }
  0xd7   :  { %v108_v27 = vadd.f32 %v1409_v25, %v107_v26  ;;  %v1508_v28 = vpop.f32.mrb[1].mxu0 }
  0xd9   :  { %112 = vst.msk [vmem:[#allocation2] sm:$0xff] %vm22_vm3, %v108_v27 }
  0xda   :  { %v283_v29 = vpop.f32.mrb[2].mxu0 }
  0xdb   :  { %v284_v30 = vadd.f32 %v1409_v25, %v283_v29  ;;  %v1518_v31 = vpop.f32.mrb[3].mxu0 }
  0xdd   :  { %288 = vst.msk [vmem:[#allocation2 + $0x10] sm:$0xff] %vm22_vm3, %v284_v30 }
  0xde   :  { %v459_v32 = vpop.f32.mrb[4].mxu0 }
  0xdf   :  { %v460_v33 = vadd.f32 %v1409_v25, %v459_v32  ;;  %v1528_v34 = vpop.f32.mrb[5].mxu0 }
  0xe0   :  { %v731_v38 = vld [vmem:[#allocation2] sm:$0xff]  ;;  %v195_v43 = vpop.f32.mrb[0].mxu1 }
  0xe1   :  { %464 = vst.msk [vmem:[#allocation2 + $0x20] sm:$0xff] %vm22_vm3, %v460_v33  ;;  %v196_v44 = vadd.f32 %v1409_v25, %v195_v43  ;;  %v1513_v45 = vpop.f32.mrb[1].mxu1 }
  0xe2   :  { %v635_v35 = vpop.f32.mrb[6].mxu0 }
  0xe3   :  { %v636_v36 = vadd.f32 %v1409_v25, %v635_v35  ;;  %v1538_v37 = vpop.f32.mrb[7].mxu0  ;;  %200 = vst.msk [vmem:[#allocation2 + $0x8] sm:$0xff] %vm22_vm3, %v196_v44 }
  0xe4   :  { %v898_v60 = vld [vmem:[#allocation2 + $0x10] sm:$0xff] }
  0xe5   :  { %640 = vst.msk [vmem:[#allocation2 + $0x30] sm:$0xff] %vm22_vm3, %v636_v36  ;;  %v371_v46 = vpop.f32.mrb[2].mxu1 }
  0xe6   :  { %v372_v47 = vadd.f32 %v1409_v25, %v371_v46  ;;  %v1523_v48 = vpop.f32.mrb[3].mxu1 }
  0xe8   :  { %376 = vst.msk [vmem:[#allocation2 + $0x18] sm:$0xff] %vm22_vm3, %v372_v47  ;;  %v1062_v7 = vld [vmem:[#allocation2 + $0x20] sm:$0xff] }
  0xe9   :  { %v547_v49 = vpop.f32.mrb[4].mxu1 }
  0xea   :  { %v805_v39 = vpop.f32.mrb[8].mxu0  ;;  %v548_v50 = vadd.f32 %v1409_v25, %v547_v49  ;;  %v1533_v51 = vpop.f32.mrb[5].mxu1  ;;  %v816_v55 = vld [vmem:[#allocation2 + $0x8] sm:$0xff] }
  0xeb   :  { %v809_v40 = vadd.f32 %v805_v39, %v731_v38  ;;  %v1554_v41 = vpop.f32.mrb[9].mxu0 }
  0xec   :  { %552 = vst.msk [vmem:[#allocation2 + $0x28] sm:$0xff] %vm22_vm3, %v548_v50  ;;  %v1226_v20 = vld [vmem:[#allocation2 + $0x30] sm:$0xff] }
  0xed   :  { %1684 = vtanh.f32 %v809_v40  ;;  %v723_v52 = vpop.f32.mrb[6].mxu1 }
  0xee   :  { %v724_v53 = vadd.f32 %v1409_v25, %v723_v52  ;;  %v1543_v54 = vpop.f32.mrb[7].mxu1 }
  0xef   :  { %v980_v1 = vld [vmem:[#allocation2 + $0x18] sm:$0xff] }
  0xf0   :  { %728 = vst.msk [vmem:[#allocation2 + $0x38] sm:$0xff] %vm22_vm3, %v724_v53 }
  0xf3   :  { %v1144_v14 = vld [vmem:[#allocation2 + $0x28] sm:$0xff] }
  0xf7   :  { %v1685_v42 = vpop.eup %1684 }
  0xf8   :  { %1564 = vmatmul.mubr.msk.f32.vlgmr.msra.gmra.mrb[8].mxu1 %vm22_vm3, %v1685_v42 }
  0xf9   :  { %1652 = vmatpush3.bf16.msra.mxu1 %v1807_v11  ;;  %1585 = vmatprep.mubr.msk.f32.mxu1 %vm1725_vm1, %v1724_v2 }
  0xfa   :  { %1653 = vmatprep.subr.bf16.mxu1 %v1726_v12 }
  0xfd   :  { %1655 = vmatpush3.bf16.msra.mxu1 %v1818_v15 }
  0xfe   :  { %1662 = vmatprep.subr.bf16.mxu1 %v1726_v12 }
 0x1cb   :  { %v886_v56 = vpop.f32.mrb[8].mxu1 }
 0x1cc   :  { %v890_v57 = vadd.f32 %v886_v56, %v816_v55  ;;  %v1565_v58 = vpop.f32.mrb[9].mxu1 }
 0x1ce   :  { %1686 = vtanh.f32 %v890_v57 }
 0x1d8   :  { %v1687_v59 = vpop.eup %1686 }
 0x1d9   :  { %1575 = vmatmul.mubr.msk.f32.vlgmr.msra.gmra.mrb[10].mxu0 %vm22_vm3, %v1687_v59 }
 0x1da   :  { %1658 = vmatpush3.bf16.msra.mxu0 %v1807_v11  ;;  %1596 = vmatprep.mubr.msk.f32.mxu0 %vm1725_vm1, %v1724_v2 }
 0x1db   :  { %1659 = vmatprep.subr.bf16.mxu0 %v1726_v12 }
 0x1de   :  { %1661 = vmatpush3.bf16.msra.mxu0 %v1818_v15 }
 0x1df   :  { %1668 = vmatprep.subr.bf16.mxu0 %v1726_v12 }
 0x2ac   :  { %v968_v61 = vpop.f32.mrb[10].mxu0 }
 0x2ad   :  { %v972_v62 = vadd.f32 %v968_v61, %v898_v60  ;;  %v1576_v63 = vpop.f32.mrb[11].mxu0 }
 0x2af   :  { %1688 = vtanh.f32 %v972_v62 }
 0x2b9   :  { %v1689_v0 = vpop.eup %1688 }
 0x2ba   :  { %1586 = vmatmul.mubr.msk.f32.vlgmr.msra.gmra.mrb[10].mxu1 %vm22_vm3, %v1689_v0 }
 0x2bb   :  { %1664 = vmatpush3.bf16.msra.mxu1 %v1807_v11  ;;  %1607 = vmatprep.mubr.msk.f32.mxu1 %vm1725_vm1, %v1724_v2 }
 0x2bc   :  { %1665 = vmatprep.subr.bf16.mxu1 %v1726_v12 }
 0x2bf   :  { %1667 = vmatpush3.bf16.msra.mxu1 %v1818_v15 }
 0x2c0   :  { %1674 = vmatprep.subr.bf16.mxu1 %v1726_v12 }
 0x38d   :  { %v1050_v3 = vpop.f32.mrb[10].mxu1 }
 0x38e   :  { %v1054_v4 = vadd.f32 %v1050_v3, %v980_v1  ;;  %v1587_v5 = vpop.f32.mrb[11].mxu1 }
 0x390   :  { %1690 = vtanh.f32 %v1054_v4 }
 0x39a   :  { %v1691_v6 = vpop.eup %1690 }
 0x39b   :  { %1597 = vmatmul.mubr.msk.f32.vlgmr.msra.gmra.mrb[12].mxu0 %vm22_vm3, %v1691_v6 }
 0x39c   :  { %1670 = vmatpush3.bf16.msra.mxu0 %v1807_v11  ;;  %1618 = vmatprep.mubr.msk.f32.mxu0 %vm1725_vm1, %v1724_v2 }
 0x39d   :  { %1671 = vmatprep.subr.bf16.mxu0 %v1726_v12 }
 0x3a0   :  { %1673 = vmatpush3.bf16.msra.mxu0 %v1818_v15 }
 0x46e   :  { %v1132_v8 = vpop.f32.mrb[12].mxu0 }
 0x46f   :  { %v1136_v9 = vadd.f32 %v1132_v8, %v1062_v7  ;;  %v1598_v10 = vpop.f32.mrb[13].mxu0 }
 0x471   :  { %1692 = vtanh.f32 %v1136_v9 }
 0x47b   :  { %v1693_v13 = vpop.eup %1692 }
 0x47c   :  { %1608 = vmatmul.mubr.msk.f32.vlgmr.msra.gmra.mrb[12].mxu1 %vm22_vm3, %v1693_v13 }
 0x47d   :  { %1676 = vmatpush3.bf16.msra.mxu1 %v1807_v11  ;;  %1629 = vmatprep.mubr.msk.f32.mxu1 %vm1725_vm1, %v1724_v2  ;;  %v1308_v2 = vld [vmem:[#allocation2 + $0x38] sm:$0xff] }
 0x47e   :  { %1677 = vmatprep.subr.bf16.mxu1 %v1726_v12 }
 0x481   :  { %1679 = vmatpush3.bf16.msra.mxu1 %v1818_v15 }
 0x54f   :  { %v1214_v16 = vpop.f32.mrb[12].mxu1 }
 0x550   :  { %v1218_v17 = vadd.f32 %v1214_v16, %v1144_v14  ;;  %v1609_v18 = vpop.f32.mrb[13].mxu1 }
 0x552   :  { %1694 = vtanh.f32 %v1218_v17 }
 0x55c   :  { %v1695_v19 = vpop.eup %1694 }
 0x55d   :  { %1619 = vmatmul.mubr.msk.f32.vlgmr.msra.gmra.mrb[14].mxu0 %vm22_vm3, %v1695_v19 }
 0x630   :  { %v1296_v21 = vpop.f32.mrb[14].mxu0 }
 0x631   :  { %v1300_v22 = vadd.f32 %v1296_v21, %v1226_v20  ;;  %v1620_v23 = vpop.f32.mrb[15].mxu0 }
 0x633   :  { %1696 = vtanh.f32 %v1300_v22 }
 0x63d   :  { %v1697_v11 = vpop.eup %1696 }
 0x63e   :  { %1630 = vmatmul.mubr.msk.f32.vlgmr.msra.gmra.mrb[14].mxu1 %vm22_vm3, %v1697_v11 }
 0x711   :  { %v1378_v12 = vpop.f32.mrb[14].mxu1 }
 0x712   :  { %v1382_v24 = vadd.f32 %v1378_v12, %v1308_v2  ;;  %v1631_v15 = vpop.f32.mrb[15].mxu1 }
 0x714   :  { %1698 = vtanh.f32 %v1382_v24 }
 0x71e   :  { %v1699_v25 = vpop.eup %1698 }
 0x71f   :  { %1390 = vst.msk [vmem:[#allocation3] sm:$0xff] %vm22_vm3, %v1699_v25  ;;  %1394 = vst.msk [vmem:[#allocation4] sm:$0xff] %vm22_vm3, %v1699_v25 }
 0x720   :  { %1711 = shalt.err (!%p1708_p4)
}
 0x721   :  { %s1712_s6 = scalar_lea.hbm %s1944_s4, 128 }
 0x722   :  { %p1713_p5 = scmp.ne.s32.totalorder %s1944_s4, %s1712_s6  ;;  %p1716_p6 = scmp.lt.u32.totalorder %s1712_s6, %s1944_s4 }
 0x724   :  { %p1718_p7 = pnand %p1716_p6, %p1713_p5 }
 0x726   :  { %1721 = shalt.err (!%p1718_p7)
}
 0x727   :  { %1404 = dma.vmem_to_hbm [thread:$0]  %s1402_s3, 128, %s1944_s4, [#allocation5]  }
 0x728   :  { %1722 = dma.done.wait [#allocation5], 128  }
 0x729   :  { %1723 = vsyncadd [#allocation5], 4294967168 }
 0x72a   :  { %1408 = vsyncpa [#allocation5], 1 }

</bundles_post_ra>
